<compile_context>
chip_gen: v6e
topology: v6e:2x2x1
jax: 0.10.0
libtpu: 0.0.40
codegen_flags: <defaults>
</compile_context>

<pallas_src>
import functools

import jax
import jax.numpy as jnp
from jax.experimental import pallas as pl
from jax.experimental.pallas import tpu as pltpu

# On v6e/v7x the MXU is native bf16: set to jnp.bfloat16 for maximum matmul
# throughput (accumulation stays f32 via preferred_element_type; relax the test
# tolerance to ~2e-2 if you flip this). Kept f32 here so the toy test matches
# the reference to 1e-4 — at these shapes the kernel is memory-bound anyway.
MATMUL_DTYPE = jnp.float32


def fused_temporal_conv_kernel(x_ref, w_ref, b_ref, o_ref, *, num_layers, TC):
    """All TemporalConv layers fused on one lane-dense row slab.

    x_ref: (tm, T*C)         input rows, (T, C) collapsed into lanes
    w_ref: (L, T*C, 2*T*C)   per-layer banded conv+GLU weights (VMEM-resident)
    b_ref: (L, 1, 2*T*C)     per-layer biases expanded to lane layout
    o_ref: (tm, T*C)         output rows
    """
    x = x_ref[...].astype(jnp.float32)
    for l in range(num_layers):                      # L is small & static: unrolled
        w = w_ref[l].astype(MATMUL_DTYPE)
        z = jnp.dot(x.astype(MATMUL_DTYPE), w,       # one full-depth MXU matmul
                    preferred_element_type=jnp.float32)
        z = z + b_ref[l]                             # (1, 2*T*C) broadcast bias
        a = z[:, :TC]                                # lane-aligned split (TC = 128)
        g = z[:, TC:]
        x = a * jax.nn.sigmoid(g) + x                # GLU + residual, f32 (VPU/EUP)
    o_ref[...] = x.astype(o_ref.dtype)


def _band_weight_and_bias(w_kco, bias, k, d, T, C):
    """Expand a (1, k) dilated conv + GLU split into a dense band matrix.

    w_kco: (k, C, 2C) taps, channels-last; bias: (2C,).
    Returns band (T*C, 2*T*C) and bias_lanes (2*T*C,). Zero padding of the conv
    is encoded by simply omitting out-of-range taps from the band.
    """
    pad = d * (k - 1) // 2
    # TODO(synk): even effective spans (d*(k-1) odd) change the PyTorch output
    # length and break its residual add; rejected rather than emulated.
    assert (d * (k - 1)) % 2 == 0, "unsupported even conv span"
    TC = T * C
    val = jnp.zeros((TC, TC), w_kco.dtype)
    gate = jnp.zeros((TC, TC), w_kco.dtype)
    for j in range(k):                               # small static host-side loops
        for t_out in range(T):
            t_in = t_out + j * d - pad
            if 0 <= t_in < T:
                r, c = t_in * C, t_out * C
                val = val.at[r:r + C, c:c + C].add(w_kco[j, :, :C])
                gate = gate.at[r:r + C, c:c + C].add(w_kco[j, :, C:])
    band = jnp.concatenate([val, gate], axis=1)                         # (TC, 2TC)
    bias_lanes = jnp.concatenate([jnp.tile(bias[:C], T),
                                  jnp.tile(bias[C:], T)])               # (2TC,)
    return band, bias_lanes


def _pick_row_tile(M, row_bytes, vmem_budget_bytes=4 << 20):
    """Largest multiple of 8 dividing M, within a VMEM budget, grid >= 2 if possible."""
    if M <= 8 or M % 8 != 0:
        return M                                 # single block covering full rows
    cap = max(8, vmem_budget_bytes // row_bytes)
    if M >= 16:
        cap = min(cap, M // 2)                   # >= 2 grid steps for v7x's 2 TCs
    tm, cand = 8, 8
    while cand <= min(M, cap):
        if M % cand == 0:
            tm = cand
        cand += 8
    return tm


def temporal_conv_pallas(x, layer_params):
    """x: (B, N, T, C) f32; layer_params: list of (w_kco (k,C,2C), bias (2C,), k, d)."""
    B, N, T, C = x.shape
    M, TC = B * N, T * C
    L = len(layer_params)

    bands, biases = zip(*[_band_weight_and_bias(w, b, k, d, T, C)
                          for (w, b, k, d) in layer_params])
    w_stack = jnp.stack(bands)                       # (L, T*C, 2*T*C)  -- tiny
    b_stack = jnp.stack(biases)[:, None, :]          # (L, 1, 2*T*C)

    y = x.reshape(M, TC)                             # row-major: relayout-free view
    tm = _pick_row_tile(M, TC * 4)

    kernel = functools.partial(fused_temporal_conv_kernel, num_layers=L, TC=TC)
    out = pl.pallas_call(
        kernel,
        out_shape=jax.ShapeDtypeStruct((M, TC), x.dtype),
        grid_spec=pltpu.PrefetchScalarGridSpec(
            num_scalar_prefetch=0,
            grid=(M // tm,),
            in_specs=[
                pl.BlockSpec((tm, TC), lambda i: (i, 0)),
                pl.BlockSpec((L, TC, 2 * TC), lambda i: (0, 0, 0)),
                pl.BlockSpec((L, 1, 2 * TC), lambda i: (0, 0, 0)),
            ],
            out_specs=pl.BlockSpec((tm, TC), lambda i: (i, 0)),
        ),
        compiler_params=pltpu.CompilerParams(
            dimension_semantics=("parallel",)),
    )(y, w_stack, b_stack)
    return out.reshape(B, N, T, C)


def temporal_conv_reference(x, torch_layer_params):
    """Pure-JAX reference mirroring the PyTorch forward (NCHW conv + GLU)."""
    conv_in = jnp.transpose(x, (0, 3, 1, 2))  # (B, C, N, T)
    C = conv_in.shape[1]
    for (w_oihw, bias, k, d) in torch_layer_params:
        pad = d * (k - 1) // 2
        out = jax.lax.conv_general_dilated(
            conv_in, w_oihw,
            window_strides=(1, 1),
            padding=((0, 0), (pad, pad)),
            rhs_dilation=(1, d),
            dimension_numbers=("NCHW", "OIHW", "NCHW"),
        ) + bias[None, :, None, None]
        a, g = out[:, :C], out[:, C:]
        conv_in = a * jax.nn.sigmoid(g) + conv_in
    return jnp.transpose(conv_in, (0, 2, 3, 1))


if __name__ == "__main__":
    # Module config: TemporalConv(in_c=8, k=[3, 3], d=[1, 2])
    B, N, T, C = 2, 4, 16, 8          # T*C = 128 -> lane-dense slab
    ks = [3, 3]
    ds = [1, 2]

    key = jax.random.PRNGKey(0)
    key, kx = jax.random.split(key)
    x = jax.random.normal(kx, (B, N, T, C), dtype=jnp.float32)

    torch_params = []   # (w_oihw (2C,C,1,k), bias (2C,), k, d) — torch Conv2d layout
    pallas_params = []  # (w_kco  (k,C,2C),   bias (2C,), k, d) — kernel layout
    for k_i, d_i in zip(ks, ds):
        key, kw, kb = jax.random.split(key, 3)
        w = jax.random.normal(kw, (2 * C, C, 1, k_i), dtype=jnp.float32) * 0.1
        b = jax.random.normal(kb, (2 * C,), dtype=jnp.float32) * 0.05
        torch_params.append((w, b, k_i, d_i))
        w_kco = jnp.transpose(w[:, :, 0, :], (2, 1, 0))  # (k, C, 2C)
        pallas_params.append((w_kco, b, k_i, d_i))

    out = temporal_conv_pallas(x, pallas_params)
    out = jax.block_until_ready(out)

    ref = temporal_conv_reference(x, torch_params)
    assert out.shape == (B, N, T, C)
    tol = 1e-4 if MATMUL_DTYPE == jnp.float32 else 2e-2
    assert jnp.allclose(out, ref, atol=tol, rtol=tol), "mismatch vs reference"

    print("KERNEL_OK")
</pallas_src>

<mosaic_0001>
module attributes {stable_mosaic.version = 11 : i64} {
  func.func @fused_temporal_conv_kernel(%arg0: i32, %arg1: memref<8x128xf32, #tpu.memory_space<vmem>>, %arg2: memref<2x128x256xf32, #tpu.memory_space<vmem>>, %arg3: memref<2x1x256xf32, #tpu.memory_space<vmem>>, %arg4: memref<8x128xf32, #tpu.memory_space<vmem>>) attributes {dimension_semantics = [#tpu.dimension_semantics<parallel>], iteration_bounds = array<i64: 1>, scalar_prefetch = 0 : i64, scratch_operands = 0 : i64, tpu.core_type = #tpu.core_type<tc>, window_params = [{transform_indices = @transform_0, window_bounds = array<i64: 8, 128>}, {pipeline_mode = #tpu.pipeline_mode<synchronous>, transform_indices = @transform_1, window_bounds = array<i64: 2, 128, 256>}, {pipeline_mode = #tpu.pipeline_mode<synchronous>, transform_indices = @transform_2, window_bounds = array<i64: 2, 1, 256>}, {transform_indices = @transform_3, window_bounds = array<i64: 8, 128>}]} {
    %c0 = arith.constant 0 : index
    %c0_0 = arith.constant 0 : index
    %0 = vector.load %arg1[%c0, %c0_0] : memref<8x128xf32, #tpu.memory_space<vmem>>, vector<8x128xf32>
    %c0_1 = arith.constant 0 : index
    %c0_2 = arith.constant 0 : index
    %c0_3 = arith.constant 0 : index
    %1 = vector.load %arg2[%c0_1, %c0_2, %c0_3] : memref<2x128x256xf32, #tpu.memory_space<vmem>>, vector<1x128x256xf32>
    %2 = vector.shape_cast %1 : vector<1x128x256xf32> to vector<128x256xf32>
    %cst = arith.constant dense<0.000000e+00> : vector<8x256xf32>
    %3 = tpu.matmul %0, %2, %cst {dimension_numbers = #tpu.dot_dimension_numbers<[1], [0], [0], [1], [0, 0, 1, 1], [], []>} : vector<8x128xf32>, vector<128x256xf32>, vector<8x256xf32> -> vector<8x256xf32>
    %c0_4 = arith.constant 0 : index
    %c0_5 = arith.constant 0 : index
    %c0_6 = arith.constant 0 : index
    %4 = vector.load %arg3[%c0_4, %c0_5, %c0_6] : memref<2x1x256xf32, #tpu.memory_space<vmem>>, vector<1x1x256xf32>
    %5 = vector.shape_cast %4 : vector<1x1x256xf32> to vector<1x256xf32>
    %6 = vector.broadcast %5 : vector<1x256xf32> to vector<8x256xf32>
    %7 = arith.addf %3, %6 : vector<8x256xf32>
    %8 = vector.extract_strided_slice %7 {offsets = [0, 0], sizes = [8, 128], strides = [1, 1]} : vector<8x256xf32> to vector<8x128xf32>
    %9 = vector.extract_strided_slice %7 {offsets = [0, 128], sizes = [8, 128], strides = [1, 1]} : vector<8x256xf32> to vector<8x128xf32>
    %10 = arith.negf %9 : vector<8x128xf32>
    %11 = math.exp %10 : vector<8x128xf32>
    %cst_7 = arith.constant 1.000000e+00 : f32
    %12 = vector.broadcast %cst_7 : f32 to vector<8x128xf32>
    %13 = arith.addf %12, %11 : vector<8x128xf32>
    %14 = arith.divf %12, %13 : vector<8x128xf32>
    %15 = arith.mulf %8, %14 : vector<8x128xf32>
    %16 = arith.addf %15, %0 : vector<8x128xf32>
    %c1 = arith.constant 1 : index
    %c0_8 = arith.constant 0 : index
    %c0_9 = arith.constant 0 : index
    %17 = vector.load %arg2[%c1, %c0_8, %c0_9] : memref<2x128x256xf32, #tpu.memory_space<vmem>>, vector<1x128x256xf32>
    %18 = vector.shape_cast %17 : vector<1x128x256xf32> to vector<128x256xf32>
    %cst_10 = arith.constant dense<0.000000e+00> : vector<8x256xf32>
    %19 = tpu.matmul %16, %18, %cst_10 {dimension_numbers = #tpu.dot_dimension_numbers<[1], [0], [0], [1], [0, 0, 1, 1], [], []>} : vector<8x128xf32>, vector<128x256xf32>, vector<8x256xf32> -> vector<8x256xf32>
    %c1_11 = arith.constant 1 : index
    %c0_12 = arith.constant 0 : index
    %c0_13 = arith.constant 0 : index
    %20 = vector.load %arg3[%c1_11, %c0_12, %c0_13] : memref<2x1x256xf32, #tpu.memory_space<vmem>>, vector<1x1x256xf32>
    %21 = vector.shape_cast %20 : vector<1x1x256xf32> to vector<1x256xf32>
    %22 = vector.broadcast %21 : vector<1x256xf32> to vector<8x256xf32>
    %23 = arith.addf %19, %22 : vector<8x256xf32>
    %24 = vector.extract_strided_slice %23 {offsets = [0, 0], sizes = [8, 128], strides = [1, 1]} : vector<8x256xf32> to vector<8x128xf32>
    %25 = vector.extract_strided_slice %23 {offsets = [0, 128], sizes = [8, 128], strides = [1, 1]} : vector<8x256xf32> to vector<8x128xf32>
    %26 = arith.negf %25 : vector<8x128xf32>
    %27 = math.exp %26 : vector<8x128xf32>
    %cst_14 = arith.constant 1.000000e+00 : f32
    %28 = vector.broadcast %cst_14 : f32 to vector<8x128xf32>
    %29 = arith.addf %28, %27 : vector<8x128xf32>
    %30 = arith.divf %28, %29 : vector<8x128xf32>
    %31 = arith.mulf %24, %30 : vector<8x128xf32>
    %32 = arith.addf %31, %16 : vector<8x128xf32>
    %c0_15 = arith.constant 0 : index
    %c0_16 = arith.constant 0 : index
    %33 = vector.load %arg4[%c0_15, %c0_16] : memref<8x128xf32, #tpu.memory_space<vmem>>, vector<8x128xf32>
    tpu.vector_store %arg4[%c0_15, %c0_16], %32 {strides = array<i32>} : memref<8x128xf32, #tpu.memory_space<vmem>>, vector<8x128xf32>,
    return
  }
  func.func @transform_0(%arg0: i32) -> (i32, i32) {
    %c0_i32 = arith.constant 0 : i32
    %c0_i32_0 = arith.constant 0 : i32
    return %arg0, %c0_i32 : i32, i32
  }
  func.func @transform_1(%arg0: i32) -> (i32, i32, i32) {
    %c0_i32 = arith.constant 0 : i32
    %c0_i32_0 = arith.constant 0 : i32
    %c0_i32_1 = arith.constant 0 : i32
    %c0_i32_2 = arith.constant 0 : i32
    return %c0_i32, %c0_i32_0, %c0_i32_1 : i32, i32, i32
  }
  func.func @transform_2(%arg0: i32) -> (i32, i32, i32) {
    %c0_i32 = arith.constant 0 : i32
    %c0_i32_0 = arith.constant 0 : i32
    %c0_i32_1 = arith.constant 0 : i32
    %c0_i32_2 = arith.constant 0 : i32
    return %c0_i32, %c0_i32_0, %c0_i32_1 : i32, i32, i32
  }
  func.func @transform_3(%arg0: i32) -> (i32, i32) {
    %c0_i32 = arith.constant 0 : i32
    %c0_i32_0 = arith.constant 0 : i32
    return %arg0, %c0_i32 : i32, i32
  }
}

</mosaic_0001>

<bundles_post_ra>
// kernel: tpu_custom_call.1
= control target key start
LH: loop header
LB: loop body
LE: loop exit
PB: predicated region body
PF: predicated region fallthrough
CT: control target
= control target key end

     0   :  { %8 = vsyncpa [#allocation3], 0  ;;  %s470_s0 = inlined_call_operand.hbm [shape: f32[8,128], index: 0, kind: input, shape index: {}]   ;;  %s471_s1 = inlined_call_operand.hbm [shape: f32[2,128,256], index: 1, kind: input, shape index: {}]   ;;  %s472_s2 = inlined_call_operand.hbm [shape: f32[2,1,256], index: 2, kind: input, shape index: {}]   ;;  %s473_s3 = inlined_call_operand.hbm [shape: f32[8,128], index: 3, kind: output, shape index: {}]  }
   0x1   :  { %9 = vsyncpa [#allocation6], 0 }
   0x2   :  { %10 = vsyncpa [#allocation4], 0  ;;  %s425_s12 = smov [#allocation5]  }
   0x3   :  { %s26_s13 = sshll.u32 %s425_s12, 4  ;;  %s27_s13 = int_to_ptr.vmem [resolvable:$true] %s26_s13 }
   0x4   :  { %s347_s14 = scalar_lea.vmem %s27_s13, 8192  ;;  %p352_p1 = scmp.lt.s32.totalorder %s27_s13, %s27_s13 }
   0x5   :  { %p348_p0 = scmp.ne.s32.totalorder %s27_s13, %s347_s14  ;;  %p353_p2 = scmp.lt.s32.totalorder %s347_s14, %s347_s14 }
   0x7   :  { %p354_p3 = por %p353_p2, %p352_p1 }
   0x9   :  { %p355_p4 = pnand %p354_p3, %p348_p0 }
   0xb   :  { %358 = shalt.err (!%p355_p4)
}
   0xc   :  { %s426_s15 = smov 256   ;;  %s427_s16 = smov 16  }
   0xd   :  { %32 = dma.hbm_to_vmem [thread:$0]  %s471_s1, 8192, %s27_s13, [#allocation6], %s426_s15, %s426_s15, %s427_s16  }
   0xe   :  { %s428_s19 = smov [#allocation2]   ;;  %s429_s21 = smov [#allocation7]  }
   0xf   :  { %s17_s20 = sshll.u32 %s428_s19, 4  ;;  %s38_s22 = sshll.u32 %s429_s21, 4  ;;  %s18_s20 = int_to_ptr.vmem [resolvable:$true] %s17_s20  ;;  %s39_s22 = int_to_ptr.vmem [resolvable:$true] %s38_s22 }
  0x10   :  { %s367_s23 = scalar_lea.vmem %s18_s20, 128  ;;  %p372_p6 = scmp.lt.s32.totalorder %s18_s20, %s18_s20 }
  0x11   :  { %p368_p5 = scmp.ne.s32.totalorder %s18_s20, %s367_s23  ;;  %p373_p7 = scmp.lt.s32.totalorder %s367_s23, %s367_s23 }
  0x13   :  { %p374_p8 = por %p373_p7, %p372_p6 }
  0x15   :  { %p375_p9 = pnand %p374_p8, %p368_p5 }
  0x17   :  { %378 = shalt.err (!%p375_p9)
}
  0x18   :  { %20 = dma.hbm_to_vmem [thread:$0]  %s470_s0, 128, %s18_s20, [#allocation3]  }
  0x19   :  { %s387_s26 = scalar_lea.vmem %s39_s22, 64  ;;  %p392_p11 = scmp.lt.s32.totalorder %s39_s22, %s39_s22 }
  0x1a   :  { %p388_p10 = scmp.ne.s32.totalorder %s39_s22, %s387_s26  ;;  %p393_p12 = scmp.lt.s32.totalorder %s387_s26, %s387_s26 }
  0x1c   :  { %p394_p13 = por %p393_p12, %p392_p11 }
  0x1e   :  { %p395_p0 = pnand %p394_p13, %p388_p10 }
  0x20   :  { %398 = shalt.err (!%p395_p0)
}
  0x21   :  { %s430_s1 = smov 32   ;;  %s431_s27 = smov 2  }
  0x22   :  { %44 = dma.hbm_to_vmem [thread:$0]  %s472_s2, 64, %s39_s22, [#allocation6], %s430_s1, %s430_s1, %s431_s27  }
  0x23   :  { %419 = dma.done.wait [#allocation3], 128  }
  0x24   :  { %420 = vsyncadd [#allocation3], 4294967168 }
  0x25   :  { %421 = dma.done.wait [#allocation6], 8256  }
  0x26   :  { %422 = vsyncadd [#allocation6], 4294959040  ;;  %v432_v0 = vmov 0.0   ;;  %v86_v1 = vld [vmem:[#allocation5 + $0xf8] sm:$0xff]  ;;  %v85_v2 = vld [vmem:[#allocation5 + $0xf0] sm:$0xff]  ;;  %s433_s0 = smov [#allocation8]  }
  0x27   :  { %163 = vmatprep.mubr.f32.mxu0 %v432_v0  ;;  %288 = vmatprep.mubr.f32.mxu1 %v432_v0  ;;  %v84_v3 = vld [vmem:[#allocation5 + $0xe8] sm:$0xff]  ;;  %v83_v4 = vld [vmem:[#allocation5 + $0xe0] sm:$0xff]  ;;  %v82_v5 = vld [vmem:[#allocation5 + $0xd8] sm:$0xff]  ;;  %s310_s2 = sshll.u32 %s433_s0, 4  ;;  %s311_s2 = int_to_ptr.vmem [resolvable:$true] %s310_s2 }
  0x28   :  { %99 = vmatprep.subr.mxu0 %v86_v1  ;;  %v81_v6 = vld [vmem:[#allocation5 + $0xd0] sm:$0xff]  ;;  %v80_v7 = vld [vmem:[#allocation5 + $0xc8] sm:$0xff]  ;;  %v79_v8 = vld [vmem:[#allocation5 + $0xc0] sm:$0xff]  ;;  %s399_s30 = scalar_lea.vmem %s311_s2, 128  ;;  %p404_p2 = scmp.lt.s32.totalorder %s311_s2, %s311_s2 }
  0x29   :  { %100 = vmatpush1.msra.mxu0 %v85_v2  ;;  %v78_v9 = vld [vmem:[#allocation5 + $0xb8] sm:$0xff]  ;;  %v77_v10 = vld [vmem:[#allocation5 + $0xb0] sm:$0xff]  ;;  %v76_v11 = vld [vmem:[#allocation5 + $0xa8] sm:$0xff]  ;;  %v89_v2 = vlaneseq  ;;  %p400_p1 = scmp.ne.s32.totalorder %s311_s2, %s399_s30  ;;  %p405_p3 = scmp.lt.s32.totalorder %s399_s30, %s399_s30 }
  0x2a   :  { %101 = vmatprep.subr.mxu0 %v84_v3  ;;  %v75_v12 = vld [vmem:[#allocation5 + $0xa0] sm:$0xff]  ;;  %v74_v13 = vld [vmem:[#allocation5 + $0x98] sm:$0xff]  ;;  %v73_v14 = vld [vmem:[#allocation5 + $0x90] sm:$0xff] }
  0x2b   :  { %102 = vmatpush1.msra.mxu0 %v83_v4  ;;  %v72_v15 = vld [vmem:[#allocation5 + $0x88] sm:$0xff]  ;;  %v71_v16 = vld [vmem:[#allocation5 + $0x80] sm:$0xff]  ;;  %v70_v17 = vld [vmem:[#allocation5 + $0x78] sm:$0xff]  ;;  %v90_v3 = vshrl.u32 %v89_v2, 7  ;;  %p406_p4 = por %p405_p3, %p404_p2 }
  0x2c   :  { %103 = vmatprep.subr.mxu0 %v82_v5  ;;  %v69_v18 = vld [vmem:[#allocation5 + $0x70] sm:$0xff]  ;;  %v68_v19 = vld [vmem:[#allocation5 + $0x68] sm:$0xff]  ;;  %v67_v20 = vld [vmem:[#allocation5 + $0x60] sm:$0xff] }
  0x2d   :  { %104 = vmatpush1.msra.mxu0 %v81_v6  ;;  %v66_v21 = vld [vmem:[#allocation5 + $0x58] sm:$0xff]  ;;  %v65_v22 = vld [vmem:[#allocation5 + $0x50] sm:$0xff]  ;;  %v64_v23 = vld [vmem:[#allocation5 + $0x48] sm:$0xff]  ;;  %v95_v4 = vsub.s32 1, %v90_v3  ;;  %p407_p5 = pnand %p406_p4, %p400_p1 }
  0x2e   :  { %105 = vmatprep.subr.mxu0 %v80_v7  ;;  %v63_v24 = vld [vmem:[#allocation5 + $0x40] sm:$0xff]  ;;  %v62_v25 = vld [vmem:[#allocation5 + $0x38] sm:$0xff]  ;;  %v61_v26 = vld [vmem:[#allocation5 + $0x30] sm:$0xff] }
  0x2f   :  { %106 = vmatpush1.msra.mxu0 %v79_v8  ;;  %v60_v27 = vld [vmem:[#allocation5 + $0x28] sm:$0xff]  ;;  %v59_v28 = vld [vmem:[#allocation5 + $0x20] sm:$0xff]  ;;  %v58_v29 = vld [vmem:[#allocation5 + $0x18] sm:$0xff] }
  0x30   :  { %107 = vmatprep.subr.mxu0 %v78_v9  ;;  %v57_v30 = vld [vmem:[#allocation5 + $0x10] sm:$0xff]  ;;  %v56_v31 = vld [vmem:[#allocation5 + $0x8] sm:$0xff]  ;;  %v55_v32 = vld [vmem:[#allocation5] sm:$0xff] }
  0x31   :  { %108 = vmatpush1.msra.mxu0 %v77_v10  ;;  %v463_v33 = vld [vmem:[#allocation2] sm:$0xff]  ;;  %v209_v35 = vld [vmem:[#allocation5 + $0x1f0] sm:$0xff]  ;;  %v208_v36 = vld [vmem:[#allocation5 + $0x1e8] sm:$0xff] }
  0x32   :  { %109 = vmatprep.subr.mxu0 %v76_v11  ;;  %v210_v34 = vld [vmem:[#allocation5 + $0x1f8] sm:$0xff]  ;;  %v207_v37 = vld [vmem:[#allocation5 + $0x1e0] sm:$0xff]  ;;  %v205_v39 = vld [vmem:[#allocation5 + $0x1d0] sm:$0xff] }
  0x33   :  { %110 = vmatpush1.msra.mxu0 %v75_v12  ;;  %224 = vmatprep.subr.mxu1 %v210_v34  ;;  %v206_v38 = vld [vmem:[#allocation5 + $0x1d8] sm:$0xff]  ;;  %v204_v40 = vld [vmem:[#allocation5 + $0x1c8] sm:$0xff]  ;;  %v203_v41 = vld [vmem:[#allocation5 + $0x1c0] sm:$0xff] }
  0x34   :  { %111 = vmatprep.subr.mxu0 %v74_v13  ;;  %225 = vmatpush1.msra.mxu1 %v209_v35  ;;  %v202_v42 = vld [vmem:[#allocation5 + $0x1b8] sm:$0xff]  ;;  %v201_v43 = vld [vmem:[#allocation5 + $0x1b0] sm:$0xff]  ;;  %v200_v44 = vld [vmem:[#allocation5 + $0x1a8] sm:$0xff]  ;;  %v91_v13 = vsub.s32 0, %v90_v3 }
  0x35   :  { %112 = vmatpush1.msra.mxu0 %v73_v14  ;;  %226 = vmatprep.subr.mxu1 %v208_v36  ;;  %v199_v45 = vld [vmem:[#allocation5 + $0x1a0] sm:$0xff]  ;;  %v198_v46 = vld [vmem:[#allocation5 + $0x198] sm:$0xff]  ;;  %v197_v47 = vld [vmem:[#allocation5 + $0x190] sm:$0xff] }
  0x36   :  { %113 = vmatprep.subr.mxu0 %v72_v15  ;;  %227 = vmatpush1.msra.mxu1 %v207_v37  ;;  %v196_v48 = vld [vmem:[#allocation5 + $0x188] sm:$0xff]  ;;  %v195_v49 = vld [vmem:[#allocation5 + $0x180] sm:$0xff]  ;;  %v194_v50 = vld [vmem:[#allocation5 + $0x178] sm:$0xff] }
  0x37   :  { %114 = vmatpush1.msra.mxu0 %v71_v16  ;;  %228 = vmatprep.subr.mxu1 %v206_v38  ;;  %v193_v51 = vld [vmem:[#allocation5 + $0x170] sm:$0xff]  ;;  %v192_v52 = vld [vmem:[#allocation5 + $0x168] sm:$0xff]  ;;  %v191_v53 = vld [vmem:[#allocation5 + $0x160] sm:$0xff] }
  0x38   :  { %115 = vmatprep.subr.mxu0 %v70_v17  ;;  %229 = vmatpush1.msra.mxu1 %v205_v39  ;;  %v190_v54 = vld [vmem:[#allocation5 + $0x158] sm:$0xff]  ;;  %v189_v55 = vld [vmem:[#allocation5 + $0x150] sm:$0xff]  ;;  %v188_v56 = vld [vmem:[#allocation5 + $0x148] sm:$0xff] }
  0x39   :  { %116 = vmatpush1.msra.mxu0 %v69_v18  ;;  %230 = vmatprep.subr.mxu1 %v204_v40  ;;  %v187_v57 = vld [vmem:[#allocation5 + $0x140] sm:$0xff]  ;;  %v186_v58 = vld [vmem:[#allocation5 + $0x138] sm:$0xff]  ;;  %v185_v59 = vld [vmem:[#allocation5 + $0x130] sm:$0xff] }
  0x3a   :  { %117 = vmatprep.subr.mxu0 %v68_v19  ;;  %231 = vmatpush1.msra.mxu1 %v203_v41  ;;  %v184_v60 = vld [vmem:[#allocation5 + $0x128] sm:$0xff]  ;;  %v183_v61 = vld [vmem:[#allocation5 + $0x120] sm:$0xff]  ;;  %v182_v62 = vld [vmem:[#allocation5 + $0x118] sm:$0xff] }
  0x3b   :  { %118 = vmatpush1.msra.mxu0 %v67_v20  ;;  %232 = vmatprep.subr.mxu1 %v202_v42  ;;  %v181_v63 = vld [vmem:[#allocation5 + $0x110] sm:$0xff]  ;;  %v180_v0 = vld [vmem:[#allocation5 + $0x108] sm:$0xff]  ;;  %v179_v1 = vld [vmem:[#allocation5 + $0x100] sm:$0xff] }
  0x3c   :  { %119 = vmatprep.subr.mxu0 %v66_v21  ;;  %233 = vmatpush1.msra.mxu1 %v201_v43  ;;  %v87_v5 = vld [vmem:[#allocation7] sm:$0x3]  ;;  %v212_v19 = vld [vmem:[#allocation7 + $0x2] sm:$0x3] }
  0x3d   :  { %120 = vmatpush1.msra.mxu0 %v65_v22  ;;  %234 = vmatprep.subr.mxu1 %v200_v44  ;;  %v96_v6 = vrot.slane %v87_v5, %v95_v4  ;;  %v92_v14 = vrot.slane %v87_v5, %v91_v13  ;;  %v221_v20 = vrot.slane %v212_v19, %v95_v4 }
  0x3e   :  { %121 = vmatprep.subr.mxu0 %v64_v23  ;;  %235 = vmatpush1.msra.mxu1 %v199_v45 }
  0x3f   :  { %122 = vmatpush1.msra.mxu0 %v63_v24  ;;  %236 = vmatprep.subr.mxu1 %v198_v46 }
  0x40   :  { %123 = vmatprep.subr.mxu0 %v62_v25  ;;  %237 = vmatpush1.msra.mxu1 %v197_v47 }
  0x41   :  { %124 = vmatpush1.msra.mxu0 %v61_v26  ;;  %238 = vmatprep.subr.mxu1 %v196_v48 }
  0x42   :  { %125 = vmatprep.subr.mxu0 %v60_v27  ;;  %239 = vmatpush1.msra.mxu1 %v195_v49  ;;  %v217_v27 = vrot.slane %v212_v19, %v91_v13 }
  0x43   :  { %126 = vmatpush1.msra.mxu0 %v59_v28  ;;  %240 = vmatprep.subr.mxu1 %v194_v50 }
  0x44   :  { %127 = vmatprep.subr.mxu0 %v58_v29  ;;  %241 = vmatpush1.msra.mxu1 %v193_v51 }
  0x45   :  { %128 = vmatpush1.msra.mxu0 %v57_v30  ;;  %242 = vmatprep.subr.mxu1 %v192_v52 }
  0x46   :  { %129 = vmatprep.subr.mxu0 %v56_v31  ;;  %243 = vmatpush1.msra.mxu1 %v191_v53 }
  0x47   :  { %130 = vmatpush1.msra.mxu0 %v55_v32  ;;  %244 = vmatprep.subr.mxu1 %v190_v54 }
  0x48   :  { %164 = vmatmul.mubr.f32.vlgmr.msra.gmra.mxu0 %v463_v33  ;;  %245 = vmatpush1.msra.mxu1 %v189_v55 }
  0x49   :  { %246 = vmatprep.subr.mxu1 %v188_v56 }
  0x4a   :  { %247 = vmatpush1.msra.mxu1 %v187_v57 }
  0x4b   :  { %248 = vmatprep.subr.mxu1 %v186_v58 }
  0x4c   :  { %249 = vmatpush1.msra.mxu1 %v185_v59 }
  0x4d   :  { %250 = vmatprep.subr.mxu1 %v184_v60 }
  0x4e   :  { %251 = vmatpush1.msra.mxu1 %v183_v61 }
  0x4f   :  { %252 = vmatprep.subr.mxu1 %v182_v62 }
  0x50   :  { %253 = vmatpush1.msra.mxu1 %v181_v63 }
  0x51   :  { %254 = vmatprep.subr.mxu1 %v180_v0 }
  0x52   :  { %255 = vmatpush1.msra.mxu1 %v179_v1 }
 0x108   :  { %v165_v7 = vpop.f32.mrf.mxu0 }
 0x109   :  { %v166_v15 = vadd.f32 %v165_v7, %v92_v14 }
 0x10a   :  { %v167_v8 = vpop.f32.mrf.mxu0 }
 0x10b   :  { %v168_v9 = vadd.f32 %v167_v8, %v96_v6 }
 0x10d   :  { %v320_v10 = vmul.f32 -1.442695, %v168_v9 }
 0x10f   :  { %331 = vpow2.f32 %v320_v10 }
 0x11c   :  { %v332_v11 = vpop.eup %331 }
 0x11d   :  { %v173_v12 = vadd.f32 1.0, %v332_v11 }
 0x11f   :  { %333 = vrcp.f32 %v173_v12 }
 0x12c   :  { %v334_v16 = vpop.eup %333 }
 0x12d   :  { %v176_v17 = vmul.f32 %v334_v16, %v166_v15 }
 0x12f   :  { %v177_v18 = vadd.f32 %v176_v17, %v463_v33 }
 0x131   :  { %289 = vmatmul.mubr.f32.vlgmr.msra.gmra.mxu1 %v177_v18 }
 0x1f1   :  { %v290_v21 = vpop.f32.mrf.mxu1 }
 0x1f2   :  { %v291_v28 = vadd.f32 %v290_v21, %v217_v27 }
 0x1f3   :  { %v292_v22 = vpop.f32.mrf.mxu1 }
 0x1f4   :  { %v293_v23 = vadd.f32 %v292_v22, %v221_v20 }
 0x1f6   :  { %v321_v24 = vmul.f32 -1.442695, %v293_v23 }
 0x1f8   :  { %335 = vpow2.f32 %v321_v24 }
 0x205   :  { %v336_v25 = vpop.eup %335 }
 0x206   :  { %v298_v26 = vadd.f32 1.0, %v336_v25 }
 0x208   :  { %337 = vrcp.f32 %v298_v26 }
 0x215   :  { %v338_v29 = vpop.eup %337 }
 0x216   :  { %v301_v30 = vmul.f32 %v338_v29, %v291_v28 }
 0x218   :  { %v302_v31 = vadd.f32 %v301_v30, %v177_v18 }
 0x21a   :  { %303 = vst [vmem:[#allocation8] sm:$0xff] %v302_v31 }
 0x21b   :  { %410 = shalt.err (!%p407_p5)
}
 0x21c   :  { %313 = dma.vmem_to_hbm [thread:$0]  %s311_s2, 128, %s473_s3, [#allocation4]  }
 0x21d   :  { %423 = dma.done.wait [#allocation4], 128  }
 0x21e   :  { %424 = vsyncadd [#allocation4], 4294967168 }
 0x21f   :  { %317 = vsyncpa [#allocation3], 1 }
 0x220   :  { %318 = vsyncpa [#allocation6], 1 }
 0x221   :  { %319 = vsyncpa [#allocation4], 1 }

</bundles_post_ra>
